<compile_context>
chip_gen: v6e
topology: v6e:2x2x1
jax: 0.10.0
libtpu: 0.0.40
codegen_flags: <defaults>
</compile_context>

<pallas_src>
import jax
import jax.numpy as jnp
from jax.experimental import pallas as pl
from jax.experimental.pallas import tpu as pltpu

EPS = 1e-8  # PyTorch F.cosine_similarity default eps

# VMEM budget for the double-buffered input tiles (2 inputs x 2 buffers each).
_TILE_VMEM_BUDGET = 16 * 1024 * 1024
# Scoped-VMEM limit: above v5e's 16 MiB default, equal to v6e/v7x defaults,
# well under v7x's 64 MiB physical.
_VMEM_LIMIT_BYTES = 32 * 1024 * 1024


def _cossim_kernel(x_ref, y_ref, o_ref):
    # x_ref, y_ref: (tm, D) VMEM tiles; o_ref: (1, tm) lane-dense output row.
    x = x_ref[...].astype(jnp.float32)
    y = y_ref[...].astype(jnp.float32)
    dot = jnp.sum(x * y, axis=-1)   # (tm,)
    sxx = jnp.sum(x * x, axis=-1)   # (tm,)
    syy = jnp.sum(y * y, axis=-1)   # (tm,)
    # sqrt(max(sxx*syy, eps^2)) == max(sqrt(sxx)*sqrt(syy), eps); one rsqrt
    # (EUP) + one mul instead of two sqrts and a divide.
    denom = jnp.maximum(sxx * syy, jnp.float32(EPS * EPS))
    sim = dot * jax.lax.rsqrt(denom)
    o_ref[...] = sim[None, :].astype(o_ref.dtype)


def _round_up(x, m):
    return ((x + m - 1) // m) * m


def _pick_tm(n, d, itemsize, budget_bytes):
    """Largest row tile whose 2x2 double-buffered input tiles fit the budget."""
    raw = budget_bytes // (4 * d * itemsize)   # 2 inputs x 2 pipeline buffers
    if raw >= 128:
        tm = min(2048, (raw // 128) * 128)     # lane-dense output / bf16 packing
        tm = min(tm, _round_up(n, 128))        # don't overshoot tiny problems
    else:
        # Pathologically large D: fall back to a sublane-aligned tile.
        tm = max(8, (raw // 8) * 8)
        tm = min(tm, _round_up(n, 8))
    return int(tm)


def cos_sim_loss(inputs, targets, *, tm=None):
    """Cosine similarity over the last axis, like F.cosine_similarity(dim=-1).

    Note: matches the reference module exactly — it returns the per-row
    similarity (no `1 - cos` / mean reduction).
    """
    assert inputs.shape == targets.shape
    *lead, d = inputs.shape
    n = 1
    for s in lead:
        n *= s

    out_dtype = jnp.result_type(inputs.dtype, targets.dtype)
    if not jnp.issubdtype(out_dtype, jnp.floating):
        out_dtype = jnp.float32

    # Keep inputs in their native dtype (bf16/fp16 pass-through halves HBM
    # traffic); the kernel widens to f32 in-register.
    x = inputs.reshape(n, d)
    y = targets.reshape(n, d)

    in_itemsize = max(jnp.dtype(inputs.dtype).itemsize,
                      jnp.dtype(targets.dtype).itemsize)
    if tm is None:
        tm = _pick_tm(n, d, in_itemsize, _TILE_VMEM_BUDGET)
    else:
        tm = max(8, _round_up(int(tm), 8))

    # Pad rows so n divides the tile; padded rows give sim == 0 and are
    # sliced off below.
    n_pad = _round_up(n, tm)
    if n_pad != n:
        x = jnp.pad(x, ((0, n_pad - n), (0, 0)))
        y = jnp.pad(y, ((0, n_pad - n), (0, 0)))
    n_tiles = n_pad // tm

    cost = pl.CostEstimate(
        flops=6 * n_pad * d,                 # 3 muls + 3 adds per element
        transcendentals=n_pad,               # one rsqrt per row
        bytes_accessed=2 * n_pad * d * in_itemsize
        + n_pad * jnp.dtype(out_dtype).itemsize,
    )

    out = pl.pallas_call(
        _cossim_kernel,
        out_shape=jax.ShapeDtypeStruct((n_tiles, tm), out_dtype),
        grid_spec=pltpu.PrefetchScalarGridSpec(
            num_scalar_prefetch=0,
            grid=(n_tiles,),
            in_specs=[
                pl.BlockSpec((tm, d), lambda i: (i, 0)),
                pl.BlockSpec((tm, d), lambda i: (i, 0)),
            ],
            out_specs=pl.BlockSpec((1, tm), lambda i: (i, 0)),
        ),
        compiler_params=pltpu.CompilerParams(
            dimension_semantics=("parallel",),
            vmem_limit_bytes=_VMEM_LIMIT_BYTES,
        ),
        cost_estimate=cost,
    )(x, y)

    return out.reshape(n_pad)[:n].reshape(tuple(lead))


if __name__ == "__main__":
    key = jax.random.PRNGKey(0)
    k1, k2 = jax.random.split(key)

    # Small shape consistent with the module: (B, S, D), reduce over D.
    B, S, D = 2, 8, 32
    inputs = jax.random.normal(k1, (B, S, D), dtype=jnp.float32)
    targets = jax.random.normal(k2, (B, S, D), dtype=jnp.float32)

    out = cos_sim_loss(inputs, targets)
    out = jax.block_until_ready(out)

    # Pure-JAX reference (mirrors PyTorch semantics).
    dot = jnp.sum(inputs * targets, axis=-1)
    denom = jnp.maximum(
        jnp.linalg.norm(inputs, axis=-1) * jnp.linalg.norm(targets, axis=-1), EPS
    )
    ref = dot / denom
    assert out.shape == (B, S)
    assert jnp.allclose(out, ref, atol=1e-5, rtol=1e-5)

    # Exercise the non-divisible (padding) path as well.
    B2, S2, D2 = 3, 5, 48
    a = jax.random.normal(k1, (B2, S2, D2), dtype=jnp.float32)
    b = jax.random.normal(k2, (B2, S2, D2), dtype=jnp.float32)
    out2 = jax.block_until_ready(cos_sim_loss(a, b))
    ref2 = jnp.sum(a * b, axis=-1) / jnp.maximum(
        jnp.linalg.norm(a, axis=-1) * jnp.linalg.norm(b, axis=-1), EPS
    )
    assert out2.shape == (B2, S2)
    assert jnp.allclose(out2, ref2, atol=1e-5, rtol=1e-5)

    print("KERNEL_OK")
</pallas_src>

<mosaic_0001>
module attributes {stable_mosaic.version = 11 : i64} {
  func.func @_cossim_kernel(%arg0: i32, %arg1: memref<128x32xf32, #tpu.memory_space<vmem>>, %arg2: memref<128x32xf32, #tpu.memory_space<vmem>>, %arg3: memref<1x128xf32, #tpu.memory_space<vmem>>) attributes {dimension_semantics = [#tpu.dimension_semantics<parallel>], iteration_bounds = array<i64: 1>, scalar_prefetch = 0 : i64, scratch_operands = 0 : i64, tpu.core_type = #tpu.core_type<tc>, window_params = [{transform_indices = @transform_0, window_bounds = array<i64: 128, 32>}, {transform_indices = @transform_1, window_bounds = array<i64: 128, 32>}, {transform_indices = @transform_2, window_bounds = array<i64: 1, 128>}]} {
    %c0 = arith.constant 0 : index
    %c0_0 = arith.constant 0 : index
    %0 = vector.load %arg1[%c0, %c0_0] : memref<128x32xf32, #tpu.memory_space<vmem>>, vector<128x32xf32>
    %c0_1 = arith.constant 0 : index
    %c0_2 = arith.constant 0 : index
    %1 = vector.load %arg2[%c0_1, %c0_2] : memref<128x32xf32, #tpu.memory_space<vmem>>, vector<128x32xf32>
    %2 = arith.mulf %0, %1 : vector<128x32xf32>
    %cst = arith.constant dense<0.000000e+00> : vector<128xf32>
    %3 = vector.multi_reduction <add>, %2, %cst [1] : vector<128x32xf32> to vector<128xf32>
    %4 = arith.mulf %0, %0 : vector<128x32xf32>
    %cst_3 = arith.constant dense<0.000000e+00> : vector<128xf32>
    %5 = vector.multi_reduction <add>, %4, %cst_3 [1] : vector<128x32xf32> to vector<128xf32>
    %6 = arith.mulf %1, %1 : vector<128x32xf32>
    %cst_4 = arith.constant dense<0.000000e+00> : vector<128xf32>
    %7 = vector.multi_reduction <add>, %6, %cst_4 [1] : vector<128x32xf32> to vector<128xf32>
    %8 = arith.mulf %5, %7 : vector<128xf32>
    %cst_5 = arith.constant 1.000000e-16 : f32
    %9 = vector.broadcast %cst_5 : f32 to vector<128xf32>
    %10 = arith.maximumf %8, %9 : vector<128xf32>
    %11 = math.rsqrt %10 : vector<128xf32>
    %12 = arith.mulf %3, %11 : vector<128xf32>
    %13 = vector.shape_cast %12 : vector<128xf32> to vector<1x128xf32>
    %c0_6 = arith.constant 0 : index
    %c0_7 = arith.constant 0 : index
    %14 = vector.load %arg3[%c0_6, %c0_7] : memref<1x128xf32, #tpu.memory_space<vmem>>, vector<1x128xf32>
    tpu.vector_store %arg3[%c0_6, %c0_7], %13 {strides = array<i32>} : memref<1x128xf32, #tpu.memory_space<vmem>>, vector<1x128xf32>,
    return
  }
  func.func @transform_0(%arg0: i32) -> (i32, i32) {
    %c0_i32 = arith.constant 0 : i32
    %c0_i32_0 = arith.constant 0 : i32
    return %arg0, %c0_i32 : i32, i32
  }
  func.func @transform_1(%arg0: i32) -> (i32, i32) {
    %c0_i32 = arith.constant 0 : i32
    %c0_i32_0 = arith.constant 0 : i32
    return %arg0, %c0_i32 : i32, i32
  }
  func.func @transform_2(%arg0: i32) -> (i32, i32) {
    %c0_i32 = arith.constant 0 : i32
    %c0_i32_0 = arith.constant 0 : i32
    return %arg0, %c0_i32 : i32, i32
  }
}

</mosaic_0001>

<bundles_post_ra>
// kernel: tpu_custom_call.1
= control target key start
LH: loop header
LB: loop body
LE: loop exit
PB: predicated region body
PF: predicated region fallthrough
CT: control target
= control target key end

     0   :  { %vm60_vm0 = vcmask 261120   ;;  %s823_s0 = inlined_call_operand.vmem [shape: f32[128,32], index: 0, kind: input, shape index: {}]   ;;  %s824_s1 = inlined_call_operand.vmem [shape: f32[128,32], index: 1, kind: input, shape index: {}]   ;;  %s825_s2 = inlined_call_operand.hbm [shape: f32[1,128], index: 2, kind: output, shape index: {}]  }
   0x1   :  { %v28_v0 = vld [vmem:[%s824_s1] sm:$0xff]  ;;  %v524_v2 = vld [vmem:[%s824_s1 + $0x8] sm:$0xff]  ;;  %v538_v9 = vld [vmem:[%s824_s1 + $0x10] sm:$0xff] }
   0x2   :  { %v12_v1 = vld [vmem:[%s823_s0] sm:$0xff]  ;;  %v173_v3 = vmul.f32 %v28_v0, %v28_v0  ;;  %v174_v5 = vmul.f32 %v524_v2, %v524_v2  ;;  %v531_v6 = vld [vmem:[%s823_s0 + $0x8] sm:$0xff]  ;;  %v543_v10 = vld [vmem:[%s823_s0 + $0x10] sm:$0xff]  ;;  %v175_v15 = vmul.f32 %v538_v9, %v538_v9 }
   0x3   :  { %v109_v4 = vmul.f32 %v12_v1, %v12_v1  ;;  %v44_v7 = vmul.f32 %v28_v0, %v12_v1  ;;  %v110_v8 = vmul.f32 %v531_v6, %v531_v6  ;;  %v111_v16 = vmul.f32 %v543_v10, %v543_v10  ;;  %v556_v17 = vld [vmem:[%s824_s1 + $0x18] sm:$0xff]  ;;  %v572_v23 = vld [vmem:[%s824_s1 + $0x20] sm:$0xff] }
   0x4   :  { %v189_v11 = vsel %vm60_vm0, %v173_v3, 0.0  ;;  %v192_v13 = vsel %vm60_vm0, %v174_v5, 0.0  ;;  %v561_v18 = vld [vmem:[%s823_s0 + $0x18] sm:$0xff]  ;;  %v195_v19 = vsel %vm60_vm0, %v175_v15, 0.0  ;;  %v176_v21 = vmul.f32 %v556_v17, %v556_v17  ;;  %v577_v24 = vld [vmem:[%s823_s0 + $0x20] sm:$0xff] }
   0x5   :  { %v125_v12 = vsel %vm60_vm0, %v109_v4, 0.0  ;;  %190 = vadd.xlane.f32.xlu1 %v189_v11  ;;  %v128_v14 = vsel %vm60_vm0, %v110_v8, 0.0  ;;  %v131_v20 = vsel %vm60_vm0, %v111_v16, 0.0  ;;  %v112_v22 = vmul.f32 %v561_v18, %v561_v18 }
   0x6   :  { %126 = vadd.xlane.f32.xlu0 %v125_v12 }
   0x9   :  { %193 = vadd.xlane.f32.xlu1 %v192_v13 }
   0xa   :  { %129 = vadd.xlane.f32.xlu0 %v128_v14 }
   0xb   :  { %7 = vsyncpa [#allocation3], 0  ;;  %v198_v25 = vsel %vm60_vm0, %v176_v21, 0.0  ;;  %v134_v26 = vsel %vm60_vm0, %v112_v22, 0.0  ;;  %v177_v27 = vmul.f32 %v572_v23, %v572_v23  ;;  %v113_v28 = vmul.f32 %v577_v24, %v577_v24  ;;  %v588_v29 = vld [vmem:[%s824_s1 + $0x28] sm:$0xff]  ;;  %v607_v36 = vld [vmem:[%s824_s1 + $0x30] sm:$0xff] }
   0xc   :  { %v593_v30 = vld [vmem:[%s823_s0 + $0x28] sm:$0xff]  ;;  %v178_v31 = vmul.f32 %v588_v29, %v588_v29  ;;  %v602_v35 = vsel %vm60_vm0, %v44_v7, 0.0  ;;  %v612_v37 = vld [vmem:[%s823_s0 + $0x30] sm:$0xff]  ;;  %v179_v40 = vmul.f32 %v607_v36, %v607_v36  ;;  %v623_v42 = vld [vmem:[%s824_s1 + $0x38] sm:$0xff]  ;;  %vm328_vm1 = vcmask 130112  }
   0xd   :  { %196 = vadd.xlane.f32.xlu1 %v195_v19  ;;  %v201_v32 = vsel %vm60_vm0, %v177_v27, 0.0  ;;  %v137_v33 = vsel %vm60_vm0, %v113_v28, 0.0  ;;  %v114_v34 = vmul.f32 %v593_v30, %v593_v30  ;;  %v115_v41 = vmul.f32 %v612_v37, %v612_v37  ;;  %v628_v43 = vld [vmem:[%s823_s0 + $0x38] sm:$0xff]  ;;  %v639_v48 = vld [vmem:[%s824_s1 + $0x40] sm:$0xff]  ;;  %v655_v54 = vld [vmem:[%s824_s1 + $0x48] sm:$0xff] }
   0xe   :  { %132 = vadd.xlane.f32.xlu0 %v131_v20  ;;  %v204_v38 = vsel %vm60_vm0, %v178_v31, 0.0  ;;  %v207_v44 = vsel %vm60_vm0, %v179_v40, 0.0  ;;  %v180_v46 = vmul.f32 %v623_v42, %v623_v42  ;;  %v116_v47 = vmul.f32 %v628_v43, %v628_v43  ;;  %v644_v49 = vld [vmem:[%s823_s0 + $0x40] sm:$0xff]  ;;  %v660_v55 = vld [vmem:[%s823_s0 + $0x48] sm:$0xff]  ;;  %v671_v60 = vld [vmem:[%s824_s1 + $0x50] sm:$0xff] }
   0xf   :  { %v140_v39 = vsel %vm60_vm0, %v114_v34, 0.0  ;;  %v143_v45 = vsel %vm60_vm0, %v115_v41, 0.0  ;;  %v181_v52 = vmul.f32 %v639_v48, %v639_v48  ;;  %v117_v53 = vmul.f32 %v644_v49, %v644_v49  ;;  %v676_v61 = vld [vmem:[%s823_s0 + $0x50] sm:$0xff]  ;;  %v687_v3 = vld [vmem:[%s824_s1 + $0x58] sm:$0xff]  ;;  %v703_v12 = vld [vmem:[%s824_s1 + $0x60] sm:$0xff] }
  0x10   :  { %v210_v50 = vsel %vm60_vm0, %v180_v46, 0.0  ;;  %v146_v51 = vsel %vm60_vm0, %v116_v47, 0.0  ;;  %v182_v58 = vmul.f32 %v655_v54, %v655_v54  ;;  %v118_v59 = vmul.f32 %v660_v55, %v660_v55  ;;  %v692_v4 = vld [vmem:[%s823_s0 + $0x58] sm:$0xff]  ;;  %v708_v13 = vld [vmem:[%s823_s0 + $0x60] sm:$0xff]  ;;  %v41_v20 = vld [vmem:[%s824_s1 + $0x68] sm:$0xff] }
  0x11   :  { %199 = vadd.xlane.f32.xlu1 %v198_v25  ;;  %v213_v56 = vsel %vm60_vm0, %v181_v52, 0.0  ;;  %v149_v57 = vsel %vm60_vm0, %v117_v53, 0.0  ;;  %v183_v0 = vmul.f32 %v671_v60, %v671_v60  ;;  %v119_v1 = vmul.f32 %v676_v61, %v676_v61  ;;  %v25_v21 = vld [vmem:[%s823_s0 + $0x68] sm:$0xff]  ;;  %v42_v28 = vld [vmem:[%s824_s1 + $0x70] sm:$0xff]  ;;  %v27_v40 = vld [vmem:[%s823_s0 + $0x78] sm:$0xff] }
  0x12   :  { %135 = vadd.xlane.f32.xlu0 %v134_v26  ;;  %v216_v62 = vsel %vm60_vm0, %v182_v58, 0.0  ;;  %v152_v63 = vsel %vm60_vm0, %v118_v59, 0.0  ;;  %v184_v8 = vmul.f32 %v687_v3, %v687_v3  ;;  %v120_v11 = vmul.f32 %v692_v4, %v692_v4  ;;  %v26_v31 = vld [vmem:[%s823_s0 + $0x70] sm:$0xff]  ;;  %s499_s0 = smov [#allocation2]  }
  0x13   :  { %v219_v5 = vsel %vm60_vm0, %v183_v0, 0.0  ;;  %v155_v7 = vsel %vm60_vm0, %v119_v1, 0.0  ;;  %v185_v16 = vmul.f32 %v703_v12, %v703_v12  ;;  %v121_v19 = vmul.f32 %v708_v13, %v708_v13 }
  0x14   :  { %v222_v14 = vsel %vm60_vm0, %v184_v8, 0.0  ;;  %v158_v15 = vsel %vm60_vm0, %v120_v11, 0.0  ;;  %v186_v26 = vmul.f32 %v41_v20, %v41_v20  ;;  %v122_v27 = vmul.f32 %v25_v21, %v25_v21 }
  0x15   :  { %202 = vadd.xlane.f32.xlu1 %v201_v32  ;;  %v225_v22 = vsel %vm60_vm0, %v185_v16, 0.0  ;;  %v161_v25 = vsel %vm60_vm0, %v121_v19, 0.0  ;;  %v187_v34 = vmul.f32 %v42_v28, %v42_v28  ;;  %v124_v46 = vmul.f32 %v27_v40, %v27_v40 }
  0x16   :  { %138 = vadd.xlane.f32.xlu0 %v137_v33  ;;  %v228_v32 = vsel %vm60_vm0, %v186_v26, 0.0  ;;  %v164_v33 = vsel %vm60_vm0, %v122_v27, 0.0  ;;  %v47_v53 = vmul.f32 %v556_v17, %v561_v18  ;;  %vm335_vm2 = vcmask 195712  }
  0x17   :  { %v231_v41 = vsel %vm60_vm0, %v187_v34, 0.0  ;;  %vm342_vm3 = vcmask 261312   ;;  %vm349_vm4 = vcmask 326912   ;;  %vm356_vm5 = vcmask 392512  }
  0x18   :  { %vm363_vm6 = vcmask 458112   ;;  %vm370_vm7 = vcmask 523712   ;;  %vm377_vm8 = vcmask 589312   ;;  %vm384_vm9 = vcmask 654912  }
  0x19   :  { %205 = vadd.xlane.f32.xlu1 %v204_v38  ;;  %v123_v38 = vmul.f32 %v26_v31, %v26_v31  ;;  %vm391_vm10 = vcmask 720512   ;;  %vm398_vm11 = vcmask 786112   ;;  %vm405_vm12 = vcmask 851712  }
  0x1a   :  { %141 = vadd.xlane.f32.xlu0 %v140_v39  ;;  %v43_v39 = vld [vmem:[%s824_s1 + $0x78] sm:$0xff]  ;;  %vm412_vm13 = vcmask 917312   ;;  %vm419_vm14 = vcmask 982912   ;;  %s436_s1 = sshll.u32 %s499_s0, 4  ;;  %vm426_vm15 = vcmask 1048512   ;;  %s437_s1 = int_to_ptr.vmem [resolvable:$true] %s436_s1 }
  0x1b   :  { %s477_s17 = scalar_lea.vmem %s437_s1, 16  ;;  %s481_s18 = scalar_lea.vmem %s437_s1, 32 }
  0x1c   :  { %p478_p0 = scmp.ne.s32.totalorder %s437_s1, %s477_s17  ;;  %p482_p1 = scmp.lt.s32.totalorder %s437_s1, %s437_s1 }
  0x1d   :  { %208 = vadd.xlane.f32.xlu1 %v207_v44  ;;  %v167_v44 = vsel %vm60_vm0, %v123_v38, 0.0  ;;  %p483_p2 = scmp.lt.s32.totalorder %s481_s18, %s477_s17 }
  0x1e   :  { %144 = vadd.xlane.f32.xlu0 %v143_v45  ;;  %v188_v45 = vmul.f32 %v43_v39, %v43_v39 }
  0x1f   :  { %p484_p3 = por %p483_p2, %p482_p1 }
  0x20   :  { %v234_v47 = vsel %vm60_vm0, %v188_v45, 0.0 }
  0x21   :  { %211 = vadd.xlane.f32.xlu1 %v210_v50  ;;  %v170_v50 = vsel %vm60_vm0, %v124_v46, 0.0  ;;  %p485_p4 = pnand %p484_p3, %p478_p0 }
  0x22   :  { %147 = vadd.xlane.f32.xlu0 %v146_v51  ;;  %v45_v51 = vmul.f32 %v524_v2, %v531_v6  ;;  %v49_v2 = vmul.f32 %v588_v29, %v593_v30  ;;  %v48_v6 = vmul.f32 %v572_v23, %v577_v24  ;;  %v53_v23 = vmul.f32 %v655_v54, %v660_v55 }
  0x23   :  { %v52_v24 = vmul.f32 %v639_v48, %v644_v49  ;;  %v57_v55 = vmul.f32 %v41_v20, %v25_v21  ;;  %v56_v48 = vmul.f32 %v703_v12, %v708_v13 }
  0x24   :  { %v64_v52 = vsel %vm60_vm0, %v45_v51, 0.0  ;;  %v76_v17 = vsel %vm60_vm0, %v49_v2, 0.0  ;;  %v73_v18 = vsel %vm60_vm0, %v48_v6, 0.0  ;;  %v88_v30 = vsel %vm60_vm0, %v53_v23, 0.0 }
  0x25   :  { %214 = vadd.xlane.f32.xlu1 %v213_v56  ;;  %v46_v56 = vmul.f32 %v538_v9, %v543_v10  ;;  %v51_v9 = vmul.f32 %v623_v42, %v628_v43  ;;  %v50_v10 = vmul.f32 %v607_v36, %v612_v37  ;;  %v85_v42 = vsel %vm60_vm0, %v52_v24, 0.0 }
  0x26   :  { %150 = vadd.xlane.f32.xlu0 %v149_v57  ;;  %v70_v57 = vsel %vm60_vm0, %v47_v53, 0.0  ;;  %v55_v36 = vmul.f32 %v687_v3, %v692_v4  ;;  %v54_v37 = vmul.f32 %v671_v60, %v676_v61  ;;  %v100_v49 = vsel %vm60_vm0, %v57_v55, 0.0 }
  0x27   :  { %v67_v58 = vsel %vm60_vm0, %v46_v56, 0.0  ;;  %v79_v29 = vsel %vm60_vm0, %v50_v10, 0.0  ;;  %v97_v59 = vsel %vm60_vm0, %v56_v48, 0.0 }
  0x28   :  { %v94_v43 = vsel %vm60_vm0, %v55_v36, 0.0  ;;  %v91_v54 = vsel %vm60_vm0, %v54_v37, 0.0 }
  0x29   :  { %217 = vadd.xlane.f32.xlu1 %v216_v62  ;;  %v59_v62 = vmul.f32 %v43_v39, %v27_v40 }
  0x2a   :  { %153 = vadd.xlane.f32.xlu0 %v152_v63  ;;  %v58_v63 = vmul.f32 %v42_v28, %v26_v31 }
  0x2b   :  { %v106_v60 = vsel %vm60_vm0, %v59_v62, 0.0 }
  0x2c   :  { %v103_v61 = vsel %vm60_vm0, %v58_v63, 0.0 }
  0x2d   :  { %220 = vadd.xlane.f32.xlu1 %v219_v5 }
  0x2e   :  { %156 = vadd.xlane.f32.xlu0 %v155_v7 }
  0x31   :  { %223 = vadd.xlane.f32.xlu1 %v222_v14 }
  0x32   :  { %159 = vadd.xlane.f32.xlu0 %v158_v15 }
  0x35   :  { %226 = vadd.xlane.f32.xlu1 %v225_v22 }
  0x36   :  { %162 = vadd.xlane.f32.xlu0 %v161_v25 }
  0x39   :  { %229 = vadd.xlane.f32.xlu1 %v228_v32 }
  0x3a   :  { %165 = vadd.xlane.f32.xlu0 %v164_v33 }
  0x3d   :  { %232 = vadd.xlane.f32.xlu1 %v231_v41 }
  0x3e   :  { %168 = vadd.xlane.f32.xlu0 %v167_v44 }
  0x41   :  { %235 = vadd.xlane.f32.xlu1 %v234_v47 }
  0x42   :  { %171 = vadd.xlane.f32.xlu0 %v170_v50 }
  0x45   :  { %65 = vadd.xlane.f32.xlu1 %v64_v52 }
  0x46   :  { %62 = vadd.xlane.f32.xlu0 %v602_v35  ;;  %v82_v35 = vsel %vm60_vm0, %v51_v9, 0.0 }
  0x49   :  { %71 = vadd.xlane.f32.xlu1 %v70_v57  ;;  %v317_v57 = vlaneseq }
  0x4a   :  { %68 = vadd.xlane.f32.xlu0 %v67_v58 }
  0x4b   :  { %v782_v10 = vand.u32 127, %v317_v57  ;;  %v784_v36 = vshrl.u32 %v317_v57, 7 }
  0x4d   :  { %77 = vadd.xlane.f32.xlu1 %v76_v17  ;;  %v323_v37 = vadd.s32 4294967288, %v782_v10 }
  0x4e   :  { %74 = vadd.xlane.f32.xlu0 %v73_v18 }
  0x4f   :  { %v326_v63 = vsub.s32 %v323_v37, %v784_v36 }
  0x51   :  { %83 = vadd.xlane.f32.xlu1 %v82_v35 }
  0x52   :  { %80 = vadd.xlane.f32.xlu0 %v79_v29 }
  0x55   :  { %89 = vadd.xlane.f32.xlu1 %v88_v30 }
  0x56   :  { %86 = vadd.xlane.f32.xlu0 %v85_v42 }
  0x59   :  { %95 = vadd.xlane.f32.xlu1 %v94_v43 }
  0x5a   :  { %92 = vadd.xlane.f32.xlu0 %v91_v54 }
  0x5d   :  { %101 = vadd.xlane.f32.xlu1 %v100_v49 }
  0x5e   :  { %98 = vadd.xlane.f32.xlu0 %v97_v59  ;;  %v330_v59 = vadd.s32 4294967280, %v782_v10 }
  0x61   :  { %107 = vadd.xlane.f32.xlu1 %v106_v60 }
  0x62   :  { %104 = vadd.xlane.f32.xlu0 %v103_v61  ;;  %v321_v61 = vsub.s32 %v782_v10, %v784_v36 }
  0x8e   :  { %v191_v0 = vpop.xlane.xlu1 %190 }
  0x8f   :  { %v127_v1 = vpop.xlane.xlu0 %126 }
  0x90   :  { %v237_v32 = vmul.f32 %v191_v0, %v127_v1  ;;  %v337_v1 = vadd.s32 4294967272, %v782_v10 }
  0x92   :  { %v194_v3 = vpop.xlane.xlu1 %193  ;;  %v253_v39 = vmax.f32 %v237_v32, 1e-16 }
  0x93   :  { %v130_v4 = vpop.xlane.xlu0 %129 }
  0x94   :  { %v238_v33 = vmul.f32 %v194_v3, %v130_v4  ;;  %445 = vrsqrt.f32 %v253_v39 }
  0x96   :  { %v197_v5 = vpop.xlane.xlu1 %196  ;;  %v254_v41 = vmax.f32 %v238_v33, 1e-16  ;;  %v358_v33 = vadd.s32 4294967248, %v782_v10 }
  0x97   :  { %v133_v7 = vpop.xlane.xlu0 %132 }
  0x98   :  { %v239_v40 = vmul.f32 %v197_v5, %v133_v7  ;;  %447 = vrsqrt.f32 %v254_v41  ;;  %v344_v5 = vadd.s32 4294967264, %v782_v10 }
  0x9a   :  { %v200_v8 = vpop.xlane.xlu1 %199  ;;  %v255_v47 = vmax.f32 %v239_v40, 1e-16 }
  0x9b   :  { %v136_v11 = vpop.xlane.xlu0 %135 }
  0x9c   :  { %v240_v44 = vmul.f32 %v200_v8, %v136_v11  ;;  %449 = vrsqrt.f32 %v255_v47 }
  0x9e   :  { %v203_v12 = vpop.xlane.xlu1 %202  ;;  %v256_v51 = vmax.f32 %v240_v44, 1e-16 }
  0x9f   :  { %v139_v13 = vpop.xlane.xlu0 %138 }
  0xa0   :  { %v241_v50 = vmul.f32 %v203_v12, %v139_v13  ;;  %451 = vrsqrt.f32 %v256_v51  ;;  %v365_v51 = vadd.s32 4294967240, %v782_v10 }
  0xa1   :  { %v446_v55 = vpop.eup %445 }
  0xa2   :  { %v206_v14 = vpop.xlane.xlu1 %205  ;;  %v257_v58 = vmax.f32 %v241_v50, 1e-16 }
  0xa3   :  { %v142_v15 = vpop.xlane.xlu0 %141 }
  0xa4   :  { %v242_v52 = vmul.f32 %v206_v14, %v142_v15  ;;  %453 = vrsqrt.f32 %v257_v58  ;;  %v333_v14 = vsub.s32 %v330_v59, %v784_v36  ;;  %v361_v58 = vsub.s32 %v358_v33, %v784_v36 }
  0xa5   :  { %v448_v62 = vpop.eup %447  ;;  %v386_v59 = vadd.s32 4294967216, %v782_v10  ;;  %v421_v33 = vadd.s32 4294967176, %v782_v10 }
  0xa6   :  { %v209_v16 = vpop.xlane.xlu1 %208  ;;  %v258_v6 = vmax.f32 %v242_v52, 1e-16 }
  0xa7   :  { %v145_v19 = vpop.xlane.xlu0 %144 }
  0xa8   :  { %v243_v2 = vmul.f32 %v209_v16, %v145_v19  ;;  %455 = vrsqrt.f32 %v258_v6 }
  0xa9   :  { %v450_v11 = vpop.eup %449 }
  0xaa   :  { %v212_v20 = vpop.xlane.xlu1 %211  ;;  %v259_v35 = vmax.f32 %v243_v2, 1e-16 }
  0xab   :  { %v148_v21 = vpop.xlane.xlu0 %147 }
  0xac   :  { %v244_v17 = vmul.f32 %v212_v20, %v148_v21  ;;  %457 = vrsqrt.f32 %v259_v35  ;;  %v340_v20 = vsub.s32 %v337_v1, %v784_v36 }
  0xad   :  { %v452_v15 = vpop.eup %451 }
  0xae   :  { %v215_v22 = vpop.xlane.xlu1 %214  ;;  %v260_v23 = vmax.f32 %v244_v17, 1e-16 }
  0xaf   :  { %v151_v25 = vpop.xlane.xlu0 %150 }
  0xb0   :  { %v245_v29 = vmul.f32 %v215_v22, %v151_v25  ;;  %459 = vrsqrt.f32 %v260_v23  ;;  %v351_v25 = vadd.s32 4294967256, %v782_v10  ;;  %v368_v23 = vsub.s32 %v365_v51, %v784_v36 }
  0xb2   :  { %v218_v26 = vpop.xlane.xlu1 %217  ;;  %v261_v43 = vmax.f32 %v245_v29, 1e-16 }
  0xb3   :  { %v154_v27 = vpop.xlane.xlu0 %153 }
  0xb4   :  { %v246_v24 = vmul.f32 %v218_v26, %v154_v27  ;;  %461 = vrsqrt.f32 %v261_v43 }
  0xb6   :  { %v221_v28 = vpop.xlane.xlu1 %220  ;;  %v262_v48 = vmax.f32 %v246_v24, 1e-16 }
  0xb7   :  { %v157_v31 = vpop.xlane.xlu0 %156 }
  0xb8   :  { %v247_v54 = vmul.f32 %v221_v28, %v157_v31  ;;  %463 = vrsqrt.f32 %v262_v48  ;;  %v347_v28 = vsub.s32 %v344_v5, %v784_v36 }
  0xba   :  { %v224_v34 = vpop.xlane.xlu1 %223  ;;  %v263_v7 = vmax.f32 %v247_v54, 1e-16 }
  0xbb   :  { %v160_v38 = vpop.xlane.xlu0 %159 }
  0xbc   :  { %v248_v49 = vmul.f32 %v224_v34, %v160_v38  ;;  %465 = vrsqrt.f32 %v263_v7  ;;  %v454_v34 = vpop.eup %453 }
  0xbd   :  { %v456_v41 = vpop.eup %455 }
  0xbe   :  { %v227_v45 = vpop.xlane.xlu1 %226  ;;  %v264_v12 = vmax.f32 %v248_v49, 1e-16  ;;  %v458_v2 = vpop.eup %457 }
  0xbf   :  { %v163_v46 = vpop.xlane.xlu0 %162 }
  0xc0   :  { %v249_v8 = vmul.f32 %v227_v45, %v163_v46  ;;  %467 = vrsqrt.f32 %v264_v12  ;;  %v354_v46 = vsub.s32 %v351_v25, %v784_v36  ;;  %v389_v12 = vsub.s32 %v386_v59, %v784_v36 }
  0xc2   :  { %v230_v53 = vpop.xlane.xlu1 %229  ;;  %v265_v31 = vmax.f32 %v249_v8, 1e-16 }
  0xc3   :  { %v166_v56 = vpop.xlane.xlu0 %165 }
  0xc4   :  { %v250_v13 = vmul.f32 %v230_v53, %v166_v56  ;;  %469 = vrsqrt.f32 %v265_v31 }
  0xc6   :  { %v233_v18 = vpop.xlane.xlu1 %232  ;;  %v266_v38 = vmax.f32 %v250_v13, 1e-16  ;;  %v400_v13 = vadd.s32 4294967200, %v782_v10 }
  0xc7   :  { %v169_v9 = vpop.xlane.xlu0 %168 }
  0xc8   :  { %v251_v32 = vmul.f32 %v233_v18, %v169_v9  ;;  %471 = vrsqrt.f32 %v266_v38  ;;  %v372_v18 = vadd.s32 4294967232, %v782_v10  ;;  %v460_v9 = vpop.eup %459 }
  0xca   :  { %v236_v30 = vpop.xlane.xlu1 %235  ;;  %v267_v57 = vmax.f32 %v251_v32, 1e-16  ;;  %v375_v49 = vsub.s32 %v372_v18, %v784_v36  ;;  %v403_v32 = vsub.s32 %v400_v13, %v784_v36 }
  0xcb   :  { %v172_v42 = vpop.xlane.xlu0 %171 }
  0xcc   :  { %v252_v39 = vmul.f32 %v236_v30, %v172_v42  ;;  %v379_v42 = vadd.s32 4294967224, %v782_v10  ;;  %473 = vrsqrt.f32 %v267_v57 }
  0xce   :  { %v66_v60 = vpop.xlane.xlu1 %65  ;;  %v268_v6 = vmax.f32 %v252_v39, 1e-16 }
  0xcf   :  { %v63_v0 = vpop.xlane.xlu0 %62  ;;  %v286_v3 = vmul.f32 %v448_v62, %v66_v60 }
  0xd0   :  { %v285_v4 = vmul.f32 %v446_v55, %v63_v0  ;;  %v462_v55 = vpop.eup %461  ;;  %475 = vrsqrt.f32 %v268_v6 }
  0xd1   :  { %v327_v16 = vrot.slane %v286_v3, %v326_v63  ;;  %v464_v62 = vpop.eup %463  ;;  %v393_v3 = vadd.s32 4294967208, %v782_v10 }
  0xd2   :  { %v322_v19 = vrot.slane %v285_v4, %v321_v61  ;;  %v72_v21 = vpop.xlane.xlu1 %71  ;;  %v382_v61 = vsub.s32 %v379_v42, %v784_v36  ;;  %v466_v8 = vpop.eup %465 }
  0xd3   :  { %v69_v22 = vpop.xlane.xlu0 %68  ;;  %v288_v26 = vmul.f32 %v452_v15, %v72_v21 }
  0xd4   :  { %v287_v27 = vmul.f32 %v450_v11, %v69_v22  ;;  %v329_v44 = vsel %vm328_vm1, %v327_v16, %v322_v19  ;;  %v396_v19 = vsub.s32 %v393_v3, %v784_v36  ;;  %v407_v22 = vadd.s32 4294967192, %v782_v10 }
  0xd5   :  { %v341_v45 = vrot.slane %v288_v26, %v340_v20 }
  0xd6   :  { %v334_v40 = vrot.slane %v287_v27, %v333_v14  ;;  %v78_v47 = vpop.xlane.xlu1 %77  ;;  %v468_v14 = vpop.eup %467 }
  0xd7   :  { %v75_v50 = vpop.xlane.xlu0 %74  ;;  %v290_v53 = vmul.f32 %v456_v41, %v78_v47  ;;  %v410_v41 = vsub.s32 %v407_v22, %v784_v36 }
  0xd8   :  { %v336_v52 = vsel %vm335_vm2, %v334_v40, %v329_v44  ;;  %v289_v56 = vmul.f32 %v454_v34, %v75_v50  ;;  %v414_v34 = vadd.s32 4294967184, %v782_v10 }
  0xd9   :  { %v355_v35 = vrot.slane %v290_v53, %v354_v46  ;;  %v343_v29 = vsel %vm342_vm3, %v341_v45, %v336_v52  ;;  %v424_v53 = vsub.s32 %v421_v33, %v784_v36 }
  0xda   :  { %v348_v17 = vrot.slane %v289_v56, %v347_v28  ;;  %v84_v24 = vpop.xlane.xlu1 %83  ;;  %v470_v28 = vpop.eup %469  ;;  %v417_v56 = vsub.s32 %v414_v34, %v784_v36 }
  0xdb   :  { %v81_v30 = vpop.xlane.xlu0 %80  ;;  %v292_v43 = vmul.f32 %v460_v9, %v84_v24  ;;  %v472_v38 = vpop.eup %471 }
  0xdc   :  { %v350_v37 = vsel %vm349_vm4, %v348_v17, %v343_v29  ;;  %v291_v54 = vmul.f32 %v458_v2, %v81_v30  ;;  %v474_v51 = vpop.eup %473 }
  0xdd   :  { %v369_v63 = vrot.slane %v292_v43, %v368_v23  ;;  %v357_v60 = vsel %vm356_vm5, %v355_v35, %v350_v37  ;;  %v476_v57 = vpop.eup %475 }
  0xde   :  { %v362_v48 = vrot.slane %v291_v54, %v361_v58  ;;  %v90_v0 = vpop.xlane.xlu1 %89 }
  0xdf   :  { %v87_v1 = vpop.xlane.xlu0 %86  ;;  %v294_v5 = vmul.f32 %v464_v62, %v90_v0 }
  0xe0   :  { %v364_v4 = vsel %vm363_vm6, %v362_v48, %v357_v60  ;;  %v293_v7 = vmul.f32 %v462_v55, %v87_v1 }
  0xe1   :  { %v383_v15 = vrot.slane %v294_v5, %v382_v61  ;;  %v371_v16 = vsel %vm370_vm7, %v369_v63, %v364_v4 }
  0xe2   :  { %v376_v11 = vrot.slane %v293_v7, %v375_v49  ;;  %v96_v20 = vpop.xlane.xlu1 %95 }
  0xe3   :  { %v93_v21 = vpop.xlane.xlu0 %92  ;;  %v296_v26 = vmul.f32 %v468_v14, %v96_v20 }
  0xe4   :  { %v378_v25 = vsel %vm377_vm8, %v376_v11, %v371_v16  ;;  %v295_v27 = vmul.f32 %v466_v8, %v93_v21 }
  0xe5   :  { %v397_v39 = vrot.slane %v296_v26, %v396_v19  ;;  %v385_v40 = vsel %vm384_vm9, %v383_v15, %v378_v25 }
  0xe6   :  { %v390_v31 = vrot.slane %v295_v27, %v389_v12  ;;  %v102_v44 = vpop.xlane.xlu1 %101 }
  0xe7   :  { %v99_v45 = vpop.xlane.xlu0 %98  ;;  %v298_v47 = vmul.f32 %v472_v38, %v102_v44 }
  0xe8   :  { %v392_v46 = vsel %vm391_vm10, %v390_v31, %v385_v40  ;;  %v297_v50 = vmul.f32 %v470_v28, %v99_v45 }
  0xe9   :  { %v411_v10 = vrot.slane %v298_v47, %v410_v41  ;;  %v399_v58 = vsel %vm398_vm11, %v397_v39, %v392_v46 }
  0xea   :  { %v404_v52 = vrot.slane %v297_v50, %v403_v32  ;;  %v108_v2 = vpop.xlane.xlu1 %107 }
  0xeb   :  { %v105_v6 = vpop.xlane.xlu0 %104  ;;  %v300_v18 = vmul.f32 %v476_v57, %v108_v2 }
  0xec   :  { %v406_v17 = vsel %vm405_vm12, %v404_v52, %v399_v58  ;;  %v299_v9 = vmul.f32 %v474_v51, %v105_v6 }
  0xed   :  { %v425_v35 = vrot.slane %v300_v18, %v424_v53  ;;  %v413_v23 = vsel %vm412_vm13, %v411_v10, %v406_v17 }
  0xee   :  { %v418_v29 = vrot.slane %v299_v9, %v417_v56 }
  0xf0   :  { %v420_v24 = vsel %vm419_vm14, %v418_v29, %v413_v23 }
  0xf1   :  { %v427_v30 = vsel %vm426_vm15, %v425_v35, %v420_v24 }
  0xf2   :  { %429 = vst [vmem:[#allocation2] sm:$0x1] %v427_v30 }
  0xf3   :  { %488 = shalt.err (!%p485_p4)
}
  0xf4   :  { %439 = dma.vmem_to_hbm [thread:$0]  %s437_s1, 16, %s825_s2, [#allocation3]  }
  0xf5   :  { %497 = dma.done.wait [#allocation3], 16  }
  0xf6   :  { %498 = vsyncadd [#allocation3], 4294967280 }
  0xf7   :  { %443 = vsyncpa [#allocation3], 1 }

</bundles_post_ra>
